<compile_context>
chip_gen: v7x
topology: tpu7x:2x2x1
jax: 0.10.0
libtpu: 0.0.40
codegen_flags: <defaults>
</compile_context>

<pallas_src>
import functools
import math

import jax
import jax.numpy as jnp
from jax.experimental import pallas as pl
from jax.experimental.pallas import tpu as pltpu


# ----------------------------- Pallas kernel -------------------------------

def _fused_router_kernel(x_ref, w1_ref, b1_ref, w2_ref, b2_ref, out_ref, acc_ref,
                         *, num_experts):
    """One (token-tile, H15-chunk) grid step.

    acc[tile] += relu(x @ W1[:, c] + b1[c]) @ W2[c, :]      (f32 VMEM accumulator)
    Last chunk: softmax over the E router lanes, sigmoid on lane E, one lane-dense store.
    """
    c = pl.program_id(1)

    @pl.when(c == 0)
    def _():
        acc_ref[...] = jnp.zeros_like(acc_ref)

    # per-tile cast to bf16 inside the kernel (no separate wrapper-side astype pass)
    x = x_ref[...].astype(jnp.bfloat16)

    # fused first layers: router Linear(H,H) | importance Linear(H,H//2), chunked
    h = jnp.dot(x, w1_ref[...], preferred_element_type=jnp.float32) + b1_ref[...]
    h = jnp.maximum(h, 0.0)                       # ReLU (Dropout p=0 is a no-op)

    # fused, block-diagonal second layers -> accumulate the lane-dense slab
    acc_ref[...] += jnp.dot(h.astype(w2_ref.dtype), w2_ref[...],
                            preferred_element_type=jnp.float32)

    @pl.when(c == pl.num_programs(1) - 1)
    def _():
        z = acc_ref[...] + b2_ref[...]            # (TM, OUT_LANES) f32
        lane = jax.lax.broadcasted_iota(jnp.int32, z.shape, 1)

        # exact softmax over the E router lanes (exact divide is free: MXU-bound)
        logits = jnp.where(lane < num_experts, z, jnp.float32(-1e30))
        m = jnp.max(logits, axis=-1, keepdims=True)
        e = jnp.exp(logits - m)
        probs = e / jnp.sum(e, axis=-1, keepdims=True)

        # exact sigmoid for the importance lane (lane == E)
        sig = 1.0 / (1.0 + jnp.exp(-z))

        out_ref[...] = jnp.where(lane < num_experts, probs,
                                 jnp.where(lane == num_experts, sig, 0.0))


# --------------------------- sizing / spec helpers ---------------------------

def _vmem_capacity_bytes():
    """Generation-aware VMEM capacity (v5e/v6e 128 MiB, v7x 64 MiB per TC)."""
    try:
        return int(pltpu.get_tpu_info().vmem_capacity_bytes)
    except Exception:
        return 64 * 1024 * 1024   # conservative fallback, correct on every generation


def _spec(shape, index_map, *, buffers=None):
    """BlockSpec with optional pipeline depth (Buffered(1) for constant-index refs)."""
    if buffers is None or buffers == 2:           # 2 == default double buffering
        return pl.BlockSpec(shape, index_map)
    try:
        return pl.BlockSpec(shape, index_map, pipeline_mode=pl.Buffered(buffers))
    except TypeError:                             # older jax: fall back to default
        return pl.BlockSpec(shape, index_map)


def _estimate_vmem_bytes(tm, h, chunk, out_lanes, in_bytes, n_chunks, x_bufs):
    """Budget every VMEM-resident tensor, incl. the (TM, chunk) f32 h + bf16 recast."""
    w_bufs = 1 if n_chunks == 1 else 2
    est = tm * h * in_bytes * x_bufs              # x tiles (pipelined)
    est += h * chunk * 2 * w_bufs                 # W1 chunk(s), bf16
    est += chunk * 4 * w_bufs                     # b1 chunk(s), f32
    est += chunk * out_lanes * 2 * w_bufs         # W2 chunk(s), bf16
    est += out_lanes * 4                          # b2 (constant, single-buffered)
    est += tm * out_lanes * 4 * 2                 # output tiles (double-buffered)
    est += tm * out_lanes * 4                     # f32 accumulator scratch
    est += tm * chunk * 6                         # (TM, chunk) f32 h + its bf16 recast
    est += 2 << 20                                # misc / compiler slack
    return est


def _choose_tm(n, h, chunk, out_lanes, in_bytes, n_chunks, x_bufs, budget):
    if n < 512:
        return max(16, ((n + 15) // 16) * 16)     # 16-row multiple (bf16 sublane packing)
    tm = 512
    while tm > 128 and _estimate_vmem_bytes(tm, h, chunk, out_lanes, in_bytes,
                                            n_chunks, x_bufs) > budget:
        tm //= 2
    return tm


def _pack_fused_params(params, num_experts):
    """Pack both MLPs into one fused first layer and one block-diagonal second layer."""
    H = params["rw1"].shape[0]
    Hh = params["iw1"].shape[1]                   # H // 2
    E = num_experts
    out_lanes = 128 * pl.cdiv(E + 1, 128)         # lane-dense (>=128) output slab
    h15 = H + Hh

    # chunk of the fused first-layer output dim; zero-pad H15 so the chunked
    # accumulator never sees garbage (relu(0)=0 contributes nothing)
    chunk = h15 if h15 <= 1024 else 512
    h15_pad = chunk * pl.cdiv(h15, chunk)

    w1 = jnp.zeros((H, h15_pad), jnp.float32)
    w1 = w1.at[:, :H].set(params["rw1"]).at[:, H:h15].set(params["iw1"])
    b1 = jnp.zeros((1, h15_pad), jnp.float32)
    b1 = b1.at[:, :H].set(params["rb1"]).at[:, H:h15].set(params["ib1"])

    w2 = jnp.zeros((h15_pad, out_lanes), jnp.float32)
    w2 = w2.at[:H, :E].set(params["rw2"])                                  # router head
    w2 = w2.at[H:h15, E:E + 1].set(params["iw2"])                          # importance head
    b2 = jnp.zeros((1, out_lanes), jnp.float32)
    b2 = b2.at[:, :E].set(params["rb2"]).at[:, E:E + 1].set(params["ib2"])

    return {
        "w1": w1.astype(jnp.bfloat16), "b1": b1,
        "w2": w2.astype(jnp.bfloat16), "b2": b2,
        "out_lanes": out_lanes, "chunk": chunk, "h15_pad": h15_pad,
    }


def fused_router_forward(x2d, fused, num_experts):
    """x2d: [N, H] (any float dtype) -> (router_probs [N, E] f32, importance [N] f32)."""
    N, H = x2d.shape
    E = num_experts
    out_lanes = fused["out_lanes"]
    chunk = fused["chunk"]
    n_chunks = fused["h15_pad"] // chunk
    in_bytes = jnp.dtype(x2d.dtype).itemsize

    cap = _vmem_capacity_bytes()
    budget = int(cap * 0.8)                       # leave headroom below physical VMEM

    # deepen the x pipeline only in the mem-bound small-H regime (v5e roofline)
    x_bufs = 3 if (H <= 512 and pl.cdiv(N, 512) >= 3) else 2

    TM = _choose_tm(N, H, chunk, out_lanes, in_bytes, n_chunks, x_bufs, budget)
    n_tiles = pl.cdiv(N, TM)                      # ragged last tile masked by Pallas
    est = _estimate_vmem_bytes(TM, H, chunk, out_lanes, in_bytes, n_chunks, x_bufs)
    vmem_limit = int(min(budget, max(32 << 20, est + (4 << 20))))
    vmem_limit = max(vmem_limit, 16 << 20)

    # constant-index refs (single chunk / bias) are single-buffered; chunked refs stream
    w_bufs = 1 if n_chunks == 1 else 2

    out = pl.pallas_call(
        functools.partial(_fused_router_kernel, num_experts=E),
        grid=(n_tiles, n_chunks),
        in_specs=[
            _spec((TM, H), lambda i, c: (i, 0), buffers=x_bufs),            # x tile
            _spec((H, chunk), lambda i, c: (0, c), buffers=w_bufs),         # W1 chunk
            _spec((1, chunk), lambda i, c: (0, c), buffers=w_bufs),         # b1 chunk
            _spec((chunk, out_lanes), lambda i, c: (c, 0), buffers=w_bufs),  # W2 chunk
            _spec((1, out_lanes), lambda i, c: (0, 0), buffers=1),          # b2 constant
        ],
        out_specs=pl.BlockSpec((TM, out_lanes), lambda i, c: (i, 0)),
        out_shape=jax.ShapeDtypeStruct((N, out_lanes), jnp.float32),
        scratch_shapes=[pltpu.VMEM((TM, out_lanes), jnp.float32)],
        compiler_params=pltpu.CompilerParams(
            dimension_semantics=("parallel", "arbitrary"),   # megacore over token tiles
            vmem_limit_bytes=vmem_limit),
    )(x2d, fused["w1"], fused["b1"], fused["w2"], fused["b2"])

    probs = out[:, :E]
    importance = out[:, E]
    return probs, importance


# ------------------------------ parameters ---------------------------------

def init_params(key, hidden_size, num_experts, top_k):
    H, E = hidden_size, num_experts
    ks = jax.random.split(key, 6)

    def xavier(k, fan_in, fan_out):
        std = math.sqrt(2.0 / (fan_in + fan_out))
        return (std * jax.random.normal(k, (fan_in, fan_out))).astype(jnp.float32)

    return {
        # BaseMoERouter.router: Linear(H,H), Linear(H,E)   (biases zero per _init_weights)
        "rw1": xavier(ks[0], H, H), "rb1": jnp.zeros((1, H), jnp.float32),
        "rw2": xavier(ks[1], H, E), "rb2": jnp.zeros((1, E), jnp.float32),
        # importance_predictor: Linear(H, H//2), Linear(H//2, 1)
        "iw1": xavier(ks[2], H, H // 2), "ib1": jnp.zeros((1, H // 2), jnp.float32),
        "iw2": xavier(ks[3], H // 2, 1), "ib2": jnp.zeros((1, 1), jnp.float32),
        # top_k_predictor: Linear(H+1, H//4), Linear(H//4, top_k)
        "tkw1": xavier(ks[4], H + 1, H // 4), "tkb1": jnp.zeros((H // 4,), jnp.float32),
        "tkw2": xavier(ks[5], H // 4, top_k), "tkb2": jnp.zeros((top_k,), jnp.float32),
    }


# ------------------------------ forward pass --------------------------------

def adaptive_router_forward(hidden_states, params, *, num_experts, top_k,
                            capacity_factor=1.5, importance_threshold=0.5,
                            adaptive_top_k=True, expert_mask=None):
    B, S, H = hidden_states.shape
    E = num_experts
    N = B * S
    x2d = hidden_states.reshape(N, H)

    # --- hot path in Pallas: fused router MLP + softmax, importance MLP + sigmoid ---
    fused = _pack_fused_params(params, E)
    router_probs_2d, imp_1d = fused_router_forward(x2d, fused, E)
    importance = imp_1d.reshape(B, S)
    router_probs = router_probs_2d.reshape(B, S, E)

    # TODO(synk): expert_mask logit masking not supported (only expert_mask=None).
    assert expert_mask is None

    # --- adaptive top-k: tiny MLP over a single pooled vector (plain-JAX glue) ---
    if adaptive_top_k:
        avg_features = x2d.astype(jnp.float32).mean(axis=0)        # [H]
        avg_importance = importance.mean()[None]                   # [1]
        combined = jnp.concatenate([avg_features, avg_importance])  # [H+1]
        tk_h = jnp.maximum(combined @ params["tkw1"] + params["tkb1"], 0.0)
        tk_logits = tk_h @ params["tkw2"] + params["tkb2"]
        tk_probs = jax.nn.softmax(tk_logits)
        # TODO(synk): host sync (matches torch .item()); dispatch/combine shape is
        # data-dependent on adaptive_k, so it cannot be made host-sync-free without
        # changing the module's output shapes.
        adaptive_k = int(jnp.argmax(tk_probs)) + 1
        current_top_k = min(adaptive_k, top_k)
    else:
        current_top_k = top_k

    # --- top-k routing + renormalization ---
    top_k_probs, top_k_indices = jax.lax.top_k(router_probs, current_top_k)
    top_k_probs = top_k_probs / (top_k_probs.sum(-1, keepdims=True) + 1e-8)

    capacity = int(N * capacity_factor * current_top_k / E)

    # --- capacity-limited dispatch / combine (sequential bookkeeping, plain JAX) ---
    # TODO(synk): dense (N, E, capacity) dispatch/combine tensors are O(N^2) HBM at
    # real sequence lengths, but they are the module's declared output format.
    flat_e = top_k_indices.reshape(-1)                              # order (b, s, k)
    flat_p = top_k_probs.reshape(-1)
    oh = jax.nn.one_hot(flat_e, E, dtype=jnp.int32)
    pos = (jnp.cumsum(oh, axis=0) * oh).sum(-1) - 1                 # slot within expert
    token_idx = jnp.arange(N * current_top_k) // current_top_k
    valid = pos < capacity
    pos_c = jnp.clip(pos, 0, capacity - 1)
    dispatch = jnp.zeros((N, E, capacity), jnp.float32).at[token_idx, flat_e, pos_c].add(
        jnp.where(valid, 1.0, 0.0))
    combine = jnp.zeros((N, E, capacity), jnp.float32).at[token_idx, flat_e, pos_c].add(
        jnp.where(valid, flat_p, 0.0))
    dispatch = dispatch.reshape(B, S, E, capacity)
    combine = combine.reshape(B, S, E, capacity)

    # --- load-balancing auxiliary loss ---
    prob_per_expert = router_probs.mean(axis=(0, 1))
    usage_rate = jax.nn.one_hot(top_k_indices, E, dtype=jnp.float32).mean(axis=(0, 1, 2))
    aux_loss = jnp.sum(prob_per_expert * usage_rate) * E

    # --- importance re-weighting of combine tensor ---
    importance_weight = (importance > importance_threshold).astype(jnp.float32)
    combine = combine * (1.0 + importance_weight[:, :, None, None])

    # TODO(synk): stateful buffers (total_tokens, expert_usage_count, routing_decisions,
    # importance_history) are training-statistics side effects and are not reproduced.

    return dispatch, combine, router_probs, aux_loss, importance


# ---------------------------------- main ------------------------------------

if __name__ == "__main__":
    key = jax.random.PRNGKey(0)
    B, S, H, E, TOPK = 2, 8, 32, 4, 2
    pkey, xkey = jax.random.split(key)
    params = init_params(pkey, H, E, TOPK)
    hidden_states = jax.random.normal(xkey, (B, S, H), jnp.float32)

    outs = adaptive_router_forward(
        hidden_states, params,
        num_experts=E, top_k=TOPK,
        capacity_factor=1.5, importance_threshold=0.5, adaptive_top_k=True)
    jax.block_until_ready(outs)

    dispatch, combine, router_probs, aux_loss, importance = outs
    assert router_probs.shape == (B, S, E)
    assert importance.shape == (B, S)
    assert dispatch.shape == combine.shape and dispatch.shape[:3] == (B, S, E)
    assert bool(jnp.all(jnp.isfinite(router_probs)))
    assert bool(jnp.all(jnp.abs(router_probs.sum(-1) - 1.0) < 1e-3))
    assert bool(jnp.all((importance >= 0.0) & (importance <= 1.0)))
    print("KERNEL_OK")
</pallas_src>

<mosaic_0001>
module attributes {stable_mosaic.version = 11 : i64} {
  func.func @_fused_router_kernel(%arg0: i32, %arg1: i32, %arg2: memref<16x32xf32, #tpu.memory_space<vmem>>, %arg3: memref<32x48xbf16, #tpu.memory_space<vmem>>, %arg4: memref<1x48xf32, #tpu.memory_space<vmem>>, %arg5: memref<48x128xbf16, #tpu.memory_space<vmem>>, %arg6: memref<1x128xf32, #tpu.memory_space<vmem>>, %arg7: memref<16x128xf32, #tpu.memory_space<vmem>>, %arg8: memref<16x128xf32, #tpu.memory_space<vmem>>) attributes {dimension_semantics = [#tpu.dimension_semantics<parallel>, #tpu.dimension_semantics<arbitrary>], iteration_bounds = array<i64: 1, 1>, scalar_prefetch = 0 : i64, scratch_operands = 1 : i64, tpu.core_type = #tpu.core_type<tc>, window_params = [{transform_indices = @transform_0, window_bounds = array<i64: 16, 32>}, {pipeline_mode = #tpu.pipeline_mode<synchronous>, transform_indices = @transform_1, window_bounds = array<i64: 32, 48>}, {pipeline_mode = #tpu.pipeline_mode<synchronous>, transform_indices = @transform_2, window_bounds = array<i64: 1, 48>}, {pipeline_mode = #tpu.pipeline_mode<synchronous>, transform_indices = @transform_3, window_bounds = array<i64: 48, 128>}, {pipeline_mode = #tpu.pipeline_mode<synchronous>, transform_indices = @transform_4, window_bounds = array<i64: 1, 128>}, {transform_indices = @transform_5, window_bounds = array<i64: 16, 128>}]} {
    %c0_i32 = arith.constant 0 : i32
    %0 = arith.cmpi eq, %arg1, %c0_i32 : i32
    %1 = arith.extui %0 : i1 to i32
    %c0_i32_0 = arith.constant 0 : i32
    %2 = arith.cmpi ne, %1, %c0_i32_0 : i32
    scf.if %2 {
      %cst_16 = arith.constant 0.000000e+00 : f32
      %21 = vector.broadcast %cst_16 : f32 to vector<16x128xf32>
      %c0_17 = arith.constant 0 : index
      %c0_18 = arith.constant 0 : index
      %22 = vector.load %arg8[%c0_17, %c0_18] : memref<16x128xf32, #tpu.memory_space<vmem>>, vector<16x128xf32>
      tpu.vector_store %arg8[%c0_17, %c0_18], %21 {strides = array<i32>} : memref<16x128xf32, #tpu.memory_space<vmem>>, vector<16x128xf32>,
    } else {
    }
    %c0 = arith.constant 0 : index
    %c0_1 = arith.constant 0 : index
    %3 = vector.load %arg2[%c0, %c0_1] : memref<16x32xf32, #tpu.memory_space<vmem>>, vector<16x32xf32>
    %4 = arith.truncf %3 : vector<16x32xf32> to vector<16x32xbf16>
    %c0_2 = arith.constant 0 : index
    %c0_3 = arith.constant 0 : index
    %5 = vector.load %arg3[%c0_2, %c0_3] : memref<32x48xbf16, #tpu.memory_space<vmem>>, vector<32x48xbf16>
    %cst = arith.constant dense<0.000000e+00> : vector<16x48xf32>
    %6 = tpu.matmul %4, %5, %cst {dimension_numbers = #tpu.dot_dimension_numbers<[1], [0], [0], [1], [0, 0, 1, 1], [], []>} : vector<16x32xbf16>, vector<32x48xbf16>, vector<16x48xf32> -> vector<16x48xf32>
    %c0_4 = arith.constant 0 : index
    %c0_5 = arith.constant 0 : index
    %7 = vector.load %arg4[%c0_4, %c0_5] : memref<1x48xf32, #tpu.memory_space<vmem>>, vector<1x48xf32>
    %8 = vector.broadcast %7 : vector<1x48xf32> to vector<16x48xf32>
    %9 = arith.addf %6, %8 : vector<16x48xf32>
    %cst_6 = arith.constant 0.000000e+00 : f32
    %10 = vector.broadcast %cst_6 : f32 to vector<16x48xf32>
    %11 = arith.maximumf %9, %10 : vector<16x48xf32>
    %c0_7 = arith.constant 0 : index
    %c0_8 = arith.constant 0 : index
    %12 = vector.load %arg8[%c0_7, %c0_8] : memref<16x128xf32, #tpu.memory_space<vmem>>, vector<16x128xf32>
    %13 = arith.truncf %11 : vector<16x48xf32> to vector<16x48xbf16>
    %c0_9 = arith.constant 0 : index
    %c0_10 = arith.constant 0 : index
    %14 = vector.load %arg5[%c0_9, %c0_10] : memref<48x128xbf16, #tpu.memory_space<vmem>>, vector<48x128xbf16>
    %cst_11 = arith.constant dense<0.000000e+00> : vector<16x128xf32>
    %15 = tpu.matmul %13, %14, %cst_11 {dimension_numbers = #tpu.dot_dimension_numbers<[1], [0], [0], [1], [0, 0, 1, 1], [], []>} : vector<16x48xbf16>, vector<48x128xbf16>, vector<16x128xf32> -> vector<16x128xf32>
    %16 = arith.addf %12, %15 : vector<16x128xf32>
    %c0_12 = arith.constant 0 : index
    %c0_13 = arith.constant 0 : index
    %17 = vector.load %arg8[%c0_12, %c0_13] : memref<16x128xf32, #tpu.memory_space<vmem>>, vector<16x128xf32>
    tpu.vector_store %arg8[%c0_12, %c0_13], %16 {strides = array<i32>} : memref<16x128xf32, #tpu.memory_space<vmem>>, vector<16x128xf32>,
    %c0_i32_14 = arith.constant 0 : i32
    %18 = arith.cmpi eq, %arg1, %c0_i32_14 : i32
    %19 = arith.extui %18 : i1 to i32
    %c0_i32_15 = arith.constant 0 : i32
    %20 = arith.cmpi ne, %19, %c0_i32_15 : i32
    scf.if %20 {
      %c0_16 = arith.constant 0 : index
      %c0_17 = arith.constant 0 : index
      %21 = vector.load %arg8[%c0_16, %c0_17] : memref<16x128xf32, #tpu.memory_space<vmem>>, vector<16x128xf32>
      %c0_18 = arith.constant 0 : index
      %c0_19 = arith.constant 0 : index
      %22 = vector.load %arg6[%c0_18, %c0_19] : memref<1x128xf32, #tpu.memory_space<vmem>>, vector<1x128xf32>
      %23 = vector.broadcast %22 : vector<1x128xf32> to vector<16x128xf32>
      %24 = arith.addf %21, %23 : vector<16x128xf32>
      %25 = tpu.iota {dimensions = array<i32: 1>} : vector<16x128xi32>
      %c4_i32 = arith.constant 4 : i32
      %26 = vector.broadcast %c4_i32 : i32 to vector<16x128xi32>
      %27 = arith.cmpi slt, %25, %26 : vector<16x128xi32>
      %cst_20 = arith.constant -1.000000e+30 : f32
      %28 = vector.broadcast %cst_20 : f32 to vector<16x128xf32>
      %29 = arith.select %27, %24, %28 : vector<16x128xi1>, vector<16x128xf32>
      %cst_21 = arith.constant dense<0xFF800000> : vector<16xf32>
      %30 = vector.multi_reduction <maximumf>, %29, %cst_21 [1] : vector<16x128xf32> to vector<16xf32>
      %31 = vector.shape_cast %30 : vector<16xf32> to vector<16x1xf32>
      %32 = vector.broadcast %31 : vector<16x1xf32> to vector<16x128xf32>
      %33 = arith.subf %29, %32 : vector<16x128xf32>
      %34 = math.exp %33 : vector<16x128xf32>
      %cst_22 = arith.constant dense<0.000000e+00> : vector<16xf32>
      %35 = vector.multi_reduction <add>, %34, %cst_22 [1] : vector<16x128xf32> to vector<16xf32>
      %36 = vector.shape_cast %35 : vector<16xf32> to vector<16x1xf32>
      %37 = vector.broadcast %36 : vector<16x1xf32> to vector<16x128xf32>
      %38 = arith.divf %34, %37 : vector<16x128xf32>
      %cst_23 = arith.constant 0.000000e+00 : f32
      %39 = vector.broadcast %cst_23 : f32 to vector<16x128xf32>
      %40 = arith.subf %39, %24 : vector<16x128xf32>
      %41 = math.exp %40 : vector<16x128xf32>
      %cst_24 = arith.constant 1.000000e+00 : f32
      %42 = vector.broadcast %cst_24 : f32 to vector<16x128xf32>
      %43 = arith.addf %42, %41 : vector<16x128xf32>
      %cst_25 = arith.constant 1.000000e+00 : f32
      %44 = vector.broadcast %cst_25 : f32 to vector<16x128xf32>
      %45 = arith.divf %44, %43 : vector<16x128xf32>
      %c4_i32_26 = arith.constant 4 : i32
      %46 = vector.broadcast %c4_i32_26 : i32 to vector<16x128xi32>
      %47 = arith.cmpi slt, %25, %46 : vector<16x128xi32>
      %c4_i32_27 = arith.constant 4 : i32
      %48 = vector.broadcast %c4_i32_27 : i32 to vector<16x128xi32>
      %49 = arith.cmpi eq, %25, %48 : vector<16x128xi32>
      %cst_28 = arith.constant 0.000000e+00 : f32
      %50 = vector.broadcast %cst_28 : f32 to vector<16x128xf32>
      %51 = arith.select %49, %45, %50 : vector<16x128xi1>, vector<16x128xf32>
      %52 = arith.select %47, %38, %51 : vector<16x128xi1>, vector<16x128xf32>
      %c0_29 = arith.constant 0 : index
      %c0_30 = arith.constant 0 : index
      %53 = vector.load %arg7[%c0_29, %c0_30] : memref<16x128xf32, #tpu.memory_space<vmem>>, vector<16x128xf32>
      tpu.vector_store %arg7[%c0_29, %c0_30], %52 {strides = array<i32>} : memref<16x128xf32, #tpu.memory_space<vmem>>, vector<16x128xf32>,
    } else {
    }
    return
  }
  func.func @transform_0(%arg0: i32, %arg1: i32) -> (i32, i32) {
    %c0_i32 = arith.constant 0 : i32
    %c0_i32_0 = arith.constant 0 : i32
    return %arg0, %c0_i32 : i32, i32
  }
  func.func @transform_1(%arg0: i32, %arg1: i32) -> (i32, i32) {
    %c0_i32 = arith.constant 0 : i32
    %c0_i32_0 = arith.constant 0 : i32
    return %c0_i32, %arg1 : i32, i32
  }
  func.func @transform_2(%arg0: i32, %arg1: i32) -> (i32, i32) {
    %c0_i32 = arith.constant 0 : i32
    %c0_i32_0 = arith.constant 0 : i32
    return %c0_i32, %arg1 : i32, i32
  }
  func.func @transform_3(%arg0: i32, %arg1: i32) -> (i32, i32) {
    %c0_i32 = arith.constant 0 : i32
    %c0_i32_0 = arith.constant 0 : i32
    return %arg1, %c0_i32 : i32, i32
  }
  func.func @transform_4(%arg0: i32, %arg1: i32) -> (i32, i32) {
    %c0_i32 = arith.constant 0 : i32
    %c0_i32_0 = arith.constant 0 : i32
    %c0_i32_1 = arith.constant 0 : i32
    return %c0_i32, %c0_i32_0 : i32, i32
  }
  func.func @transform_5(%arg0: i32, %arg1: i32) -> (i32, i32) {
    %c0_i32 = arith.constant 0 : i32
    %c0_i32_0 = arith.constant 0 : i32
    return %arg0, %c0_i32 : i32, i32
  }
}

</mosaic_0001>

<bundles_post_ra>
// kernel: tpu_custom_call.1
= control target key start
LH: loop header
LB: loop body
LE: loop exit
PB: predicated region body
PF: predicated region fallthrough
CT: control target
= control target key end

     0   :  { %10 = vsyncpa [#allocation4], 0  ;;  %s561_s0 = inlined_call_operand.hbm [shape: f32[16,32], index: 0, kind: input, shape index: {}]   ;;  %s562_s1 = inlined_call_operand.hbm [shape: bf16[32,48], index: 1, kind: input, shape index: {}]   ;;  %s563_s2 = inlined_call_operand.vmem [shape: f32[1,48], index: 2, kind: input, shape index: {}]   ;;  %s564_s3 = inlined_call_operand.hbm [shape: bf16[48,128], index: 3, kind: input, shape index: {}]   ;;  %s565_s4 = inlined_call_operand.vmem [shape: f32[1,128], index: 4, kind: input, shape index: {}]   ;;  %s566_s5 = inlined_call_operand.hbm [shape: f32[16,128], index: 5, kind: output, shape index: {}]  }
   0x1   :  { %11 = vsyncpa [#allocation7], 0 }
   0x2   :  { %12 = vsyncpa [#allocation5], 0  ;;  %s451_s18 = smov [#allocation6]   ;;  %s357_s22 = scalar_lea.hbm %s562_s1, 256 }
   0x3   :  { %s30_s19 = sshll.u32 %s451_s18, 4  ;;  %p358_p0 = scmp.ne.s32.totalorder %s562_s1, %s357_s22  ;;  %s31_s19 = int_to_ptr.vmem [resolvable:$true] %s30_s19 }
   0x4   :  { %p361_p1 = scmp.lt.u32.totalorder %s357_s22, %s562_s1 }
   0x6   :  { %p363_p2 = pnand %p361_p1, %p358_p0 }
   0x8   :  { %366 = shalt.err (!%p363_p2)
}
   0x9   :  { %s367_s27 = scalar_lea.vmem %s31_s19, 256  ;;  %p372_p4 = scmp.lt.s32.totalorder %s31_s19, %s31_s19 }
   0xa   :  { %p368_p3 = scmp.ne.s32.totalorder %s31_s19, %s367_s27  ;;  %p373_p5 = scmp.lt.s32.totalorder %s367_s27, %s367_s27 }
   0xc   :  { %p374_p6 = por %p373_p5, %p372_p4 }
   0xe   :  { %p375_p7 = pnand %p374_p6, %p368_p3 }
  0x10   :  { %378 = shalt.err (!%p375_p7)
}
  0x11   :  { %s452_s28 = smov 64   ;;  %s453_s29 = smov 4  }
  0x12   :  { %36 = dma.hbm_to_vmem [thread:$0]  %s562_s1, 256, %s31_s19, [#allocation7], %s452_s28, %s452_s28, %s453_s29  }
  0x13   :  { %s454_s7 = smov [#allocation3]   ;;  %s379_s11 = scalar_lea.hbm %s561_s0, 256 }
  0x14   :  { %s18_s8 = sshll.u32 %s454_s7, 4  ;;  %p380_p8 = scmp.ne.s32.totalorder %s561_s0, %s379_s11  ;;  %s19_s8 = int_to_ptr.vmem [resolvable:$true] %s18_s8 }
  0x15   :  { %p383_p9 = scmp.lt.u32.totalorder %s379_s11, %s561_s0 }
  0x17   :  { %p385_p10 = pnand %p383_p9, %p380_p8 }
  0x19   :  { %388 = shalt.err (!%p385_p10)
}
  0x1a   :  { %s389_s16 = scalar_lea.vmem %s19_s8, 256  ;;  %p394_p12 = scmp.lt.s32.totalorder %s19_s8, %s19_s8 }
  0x1b   :  { %p390_p11 = scmp.ne.s32.totalorder %s19_s8, %s389_s16  ;;  %p395_p13 = scmp.lt.s32.totalorder %s389_s16, %s389_s16 }
  0x1d   :  { %p396_p0 = por %p395_p13, %p394_p12 }
  0x1f   :  { %p397_p1 = pnand %p396_p0, %p390_p11 }
  0x21   :  { %400 = shalt.err (!%p397_p1)
}
  0x22   :  { %s455_s1 = smov 128   ;;  %s456_s17 = smov 8  }
  0x23   :  { %24 = dma.hbm_to_vmem [thread:$0]  %s561_s0, 256, %s19_s8, [#allocation4], %s455_s1, %s455_s1, %s456_s17  }
  0x24   :  { %s457_s20 = smov [#allocation8]   ;;  %s401_s24 = scalar_lea.hbm %s564_s3, 384 }
  0x25   :  { %s44_s21 = sshll.u32 %s457_s20, 4  ;;  %p402_p2 = scmp.ne.s32.totalorder %s564_s3, %s401_s24  ;;  %s45_s21 = int_to_ptr.vmem [resolvable:$true] %s44_s21 }
  0x26   :  { %p405_p3 = scmp.lt.u32.totalorder %s401_s24, %s564_s3 }
  0x28   :  { %p407_p4 = pnand %p405_p3, %p402_p2 }
  0x2a   :  { %410 = shalt.err (!%p407_p4)
}
  0x2b   :  { %s411_s6 = scalar_lea.vmem %s45_s21, 384  ;;  %p416_p6 = scmp.lt.s32.totalorder %s45_s21, %s45_s21 }
  0x2c   :  { %p412_p5 = scmp.ne.s32.totalorder %s45_s21, %s411_s6  ;;  %p417_p7 = scmp.lt.s32.totalorder %s411_s6, %s411_s6 }
  0x2e   :  { %p418_p8 = por %p417_p7, %p416_p6 }
  0x30   :  { %p419_p9 = pnand %p418_p8, %p412_p5 }
  0x32   :  { %422 = shalt.err (!%p419_p9)
}
  0x33   :  { %50 = dma.hbm_to_vmem [thread:$0]  %s564_s3, 384, %s45_s21, [#allocation7], %s452_s28, %s452_s28, %s453_s29  }
  0x34   :  { %445 = dma.done.wait [#allocation4], 256  }
  0x35   :  { %446 = vsyncadd [#allocation4], 4294967040 }
  0x36   :  { %447 = dma.done.wait [#allocation7], 640  }
  0x37   :  { %448 = vsyncadd [#allocation7], 4294966656  ;;  %v458_v0 = vmov 0.0   ;;  %vm459_vm0 = vmmov 0   ;;  %v336_v1 = vld [vmem:[#allocation6] sm:$0xff]   ;;  %v337_v2 = vld [vmem:[#allocation6 + $0x8] sm:$0xff]   ;;  %v232_v19 = vlaneseq }
  0x38   :  { %308 = vmatprep.subr.bf16.mxu0 %v458_v0  ;;  %312 = vmatprep.mubr.msk.bf16.mxu0 %vm459_vm0, %v458_v0  ;;  %v69_v3 = vld [vmem:[#allocation3] sm:$0xff]  ;;  %v70_v4 = vld [vmem:[#allocation3 + $0x8] sm:$0xff]  ;;  %vm95_vm1 = vcmask 261120   ;;  %v340_v8 = vld [vmem:[#allocation8 + $0x10] sm:$0xff]   ;;  %vm169_vm2 = vcmask 392192  }
  0x39   :  { %316 = vmatprep.subr.bf16.mxu1 %v458_v0  ;;  %322 = vmatprep.mubr.msk.bf16.mxu1 %vm459_vm0, %v458_v0  ;;  %v338_v5 = vld [vmem:[#allocation8] sm:$0xff]   ;;  %v71_v6 = vpack.c.bf16 %v70_v4, %v69_v3  ;;  %v339_v7 = vld [vmem:[#allocation8 + $0x8] sm:$0xff]   ;;  %v233_v20 = vand.u32 127, %v232_v19 }
  0x3a   :  { %309 = vmatpush3.bf16.msra.mxu0 %v336_v1  ;;  %317 = vmatpush3.bf16.msra.mxu1 %v338_v5  ;;  %v292_v9 = vld [vmem:[%s563_s2] ss:$0 sm:$0xff]  ;;  %s460_s2 = smov [#allocation9]  }
  0x3b   :  { %310 = vmatprep.subr.bf16.mxu0 %v458_v0  ;;  %318 = vmatprep.subr.bf16.mxu1 %v458_v0  ;;  %v300_v21 = vld [vmem:[%s565_s4] ss:$0 sm:$0xff]  ;;  %vm234_vm3 = vcmp.lt.s32.totalorder %v233_v20, 4  ;;  %vm267_vm4 = vcmp.eq.s32.totalorder %v233_v20, 4  ;;  %s279_s4 = sshll.u32 %s460_s2, 4  ;;  %s280_s4 = int_to_ptr.vmem [resolvable:$true] %s279_s4 }
  0x3c   :  { %s423_s9 = scalar_lea.vmem %s280_s4, 256  ;;  %p428_p11 = scmp.lt.s32.totalorder %s280_s4, %s280_s4 }
  0x3d   :  { %p424_p10 = scmp.ne.s32.totalorder %s280_s4, %s423_s9  ;;  %p429_p12 = scmp.lt.s32.totalorder %s423_s9, %s423_s9 }
  0x3e   :  { %311 = vmatpush3.bf16.msra.mxu0 %v337_v2  ;;  %319 = vmatpush3.bf16.msra.mxu1 %v339_v7 }
  0x3f   :  { %320 = vmatprep.subr.bf16.mxu1 %v458_v0  ;;  %p430_p13 = por %p429_p12, %p428_p11 }
  0x41   :  { %313 = vmatmul.mubr.msk.bf16.vlgmr.msra.gmra.mrb[0].mxu0 %vm95_vm1, %v71_v6  ;;  %p431_p0 = pnand %p430_p13, %p424_p10 }
  0x42   :  { %321 = vmatpush3.bf16.msra.mxu1 %v340_v8 }
 0x114   :  { %v133_v10 = vpop.f32.mrb[0].mxu0 }
 0x115   :  { %v134_v11 = vadd.f32 %v292_v9, %v133_v10  ;;  %v314_v12 = vpop.f32.mrb[1].mxu0 }
 0x116   :  { %v136_v13 = vpop.f32.mrb[2].mxu0 }
 0x117   :  { %v137_v14 = vadd.f32 %v292_v9, %v136_v13  ;;  %v315_v15 = vpop.f32.mrb[3].mxu0  ;;  %v140_v16 = vmax.f32 %v134_v11, 0.0 }
 0x119   :  { %v141_v17 = vmax.f32 %v137_v14, 0.0 }
 0x11b   :  { %v144_v18 = vpack.c.bf16 %v141_v17, %v140_v16 }
 0x11d   :  { %323 = vmatmul.mubr.msk.bf16.vlgmr.msra.gmra.mrb[0].mxu1 %vm169_vm2, %v144_v18 }
 0x1f0   :  { %v207_v22 = vpop.f32.mrb[0].mxu1 }
 0x1f1   :  { %v230_v23 = vadd.f32 %v300_v21, %v207_v22  ;;  %v324_v24 = vpop.f32.mrb[1].mxu1 }
 0x1f2   :  { %v210_v25 = vpop.f32.mrb[2].mxu1 }
 0x1f3   :  { %v255_v26 = vsub.f32 0.0, %v230_v23  ;;  %v231_v27 = vadd.f32 %v300_v21, %v210_v25  ;;  %v325_v28 = vpop.f32.mrb[3].mxu1  ;;  %v235_v29 = vsel %vm234_vm3, %v230_v23, -1e+30 }
 0x1f4   :  { %237 = vmax.xlane.f32.xlu0 %v235_v29 }
 0x1f5   :  { %v257_v30 = vmul.f32 1.442695, %v255_v26  ;;  %v256_v31 = vsub.f32 0.0, %v231_v27  ;;  %v236_v33 = vsel %vm234_vm3, %v231_v27, -1e+30 }
 0x1f7   :  { %341 = vpow2.f32 %v257_v30  ;;  %v259_v32 = vmul.f32 1.442695, %v256_v31 }
 0x1f8   :  { %239 = vmax.xlane.f32.xlu0 %v236_v33 }
 0x1f9   :  { %343 = vpow2.f32 %v259_v32 }
 0x201   :  { %v342_v34 = vpop.eup %341 }
 0x202   :  { %v261_v35 = vadd.f32 1.0, %v342_v34 }
 0x203   :  { %v344_v36 = vpop.eup %343 }
 0x204   :  { %345 = vrcp.f32 %v261_v35  ;;  %v262_v37 = vadd.f32 1.0, %v344_v36 }
 0x206   :  { %347 = vrcp.f32 %v262_v37 }
 0x20e   :  { %v346_v38 = vpop.eup %345 }
 0x20f   :  { %v268_v39 = vsel %vm267_vm4, %v346_v38, 0.0 }
 0x210   :  { %v348_v40 = vpop.eup %347 }
 0x211   :  { %v269_v41 = vsel %vm267_vm4, %v348_v40, 0.0 }
 0x281   :  { %v238_v42 = vpop.xlane.xlu0 %237 }
 0x282   :  { %v241_v43 = vsub.f32 %v235_v29, %v238_v42 }
 0x284   :  { %v243_v44 = vmul.f32 1.442695, %v241_v43 }
 0x285   :  { %v240_v45 = vpop.xlane.xlu0 %239 }
 0x286   :  { %349 = vpow2.f32 %v243_v44  ;;  %v242_v46 = vsub.f32 %v236_v33, %v240_v45 }
 0x288   :  { %v245_v47 = vmul.f32 1.442695, %v242_v46 }
 0x28a   :  { %351 = vpow2.f32 %v245_v47 }
 0x290   :  { %v350_v48 = vpop.eup %349 }
 0x291   :  { %247 = vadd.xlane.f32.xlu1 %v350_v48 }
 0x294   :  { %v352_v49 = vpop.eup %351 }
 0x295   :  { %249 = vadd.xlane.f32.xlu1 %v352_v49 }
 0x31e   :  { %v248_v50 = vpop.xlane.xlu1 %247 }
 0x31f   :  { %353 = vrcp.f32 %v248_v50 }
 0x322   :  { %v250_v51 = vpop.xlane.xlu1 %249 }
 0x323   :  { %355 = vrcp.f32 %v250_v51 }
 0x329   :  { %v354_v52 = vpop.eup %353 }
 0x32a   :  { %v252_v53 = vmul.f32 %v354_v52, %v350_v48 }
 0x32c   :  { %v270_v54 = vsel %vm234_vm3, %v252_v53, %v268_v39 }
 0x32d   :  { %v356_v55 = vpop.eup %355  ;;  %272 = vst [vmem:[#allocation9] sm:$0xff] %v270_v54 }
 0x32e   :  { %v254_v56 = vmul.f32 %v356_v55, %v352_v49 }
 0x330   :  { %v271_v57 = vsel %vm234_vm3, %v254_v56, %v269_v41 }
 0x331   :  { %273 = vst [vmem:[#allocation9 + $0x8] sm:$0xff] %v271_v57 }
 0x332   :  { %434 = shalt.err (!%p431_p0)
}
 0x333   :  { %s435_s12 = scalar_lea.hbm %s566_s5, 256 }
 0x334   :  { %p436_p1 = scmp.ne.s32.totalorder %s566_s5, %s435_s12  ;;  %p439_p2 = scmp.lt.u32.totalorder %s435_s12, %s566_s5 }
 0x336   :  { %p441_p3 = pnand %p439_p2, %p436_p1 }
 0x338   :  { %444 = shalt.err (!%p441_p3)
}
 0x339   :  { %285 = dma.vmem_to_hbm [thread:$0]  %s280_s4, 256, %s566_s5, [#allocation5], %s455_s1, %s455_s1, %s456_s17  }
 0x33a   :  { %449 = dma.done.wait [#allocation5], 256  }
 0x33b   :  { %450 = vsyncadd [#allocation5], 4294967040 }
 0x33c   :  { %289 = vsyncpa [#allocation4], 1 }
 0x33d   :  { %290 = vsyncpa [#allocation7], 1 }
 0x33e   :  { %291 = vsyncpa [#allocation5], 1 }

</bundles_post_ra>
